<compile_context>
chip_gen: v7x
topology: tpu7x:2x2x1
jax: 0.10.0
libtpu: 0.0.40
codegen_flags: <defaults>
</compile_context>

<pallas_src>
import jax
import jax.numpy as jnp
from jax.experimental import pallas as pl
from jax.experimental.pallas import tpu as pltpu

LOG_STD_MIN = -20.0
LOG_STD_MAX = 2.0

_MAX_BATCH_TILE = 4096                 # per-step state tile; overhead ~0.35 us/step
_VMEM_BUDGET = 48 * 1024 * 1024        # conservative vs. v7x's 64 MiB physical VMEM


def _round_up(x, m):
    return ((x + m - 1) // m) * m


def _make_policy_kernel(state_dim, lat_dim, action_dim):
    """lat_dim = padded hidden/lane width (multiple of 128)."""

    def kernel(x_ref, w_ref, b_ref, mean_ref, logstd_ref):
        # x_ref: (TB, state_dim); w_ref: (3, P, lat_dim); b_ref: (3, lat_dim)
        x = x_ref[...]

        # Layer 1: relu(x @ W1 + b1).  Sublane-only slice; full 128-aligned lanes.
        h1 = jnp.maximum(
            jnp.dot(x, w_ref[0, :state_dim, :],
                    preferred_element_type=jnp.float32) + b_ref[0:1, :], 0.0)

        # Layer 2: relu(h1 @ W2 + b2).  Fully padded, unsliced lanes.
        h2 = jnp.maximum(
            jnp.dot(h1, w_ref[1, :lat_dim, :],
                    preferred_element_type=jnp.float32) + b_ref[1:2, :], 0.0)

        # Fused heads: [mean | log_std | 0-pad] = h2 @ [Wm | Ws | 0] + [bm | bs | 0]
        heads = (jnp.dot(h2, w_ref[2, :lat_dim, :],
                         preferred_element_type=jnp.float32) + b_ref[2:3, :])

        mean_ref[...] = heads[:, :action_dim].astype(mean_ref.dtype)
        logstd_ref[...] = jnp.clip(heads[:, action_dim:2 * action_dim],
                                   LOG_STD_MIN, LOG_STD_MAX).astype(logstd_ref.dtype)

    return kernel


def pack_params(params):
    """Pack the 8 per-layer tensors into one padded weight buffer and one bias buffer.

    Padding: lane (output) dim -> multiple of 128, row (input) dim -> multiple of 8.
    Zero padding + relu(0)=0 keeps the forward math identical to the unpadded net.
    """
    w1, w2, wm, ws = params["w1"], params["w2"], params["wm"], params["ws"]
    b1, b2, bm, bs = params["b1"], params["b2"], params["bm"], params["bs"]

    state_dim, l1_dim = w1.shape
    l2_dim = w2.shape[1]
    action_dim = wm.shape[1]
    two_act = 2 * action_dim

    # Fused heads: [mean | log_std].
    wh = jnp.concatenate([wm, ws], axis=1)    # (l2, 2*act)
    bh = jnp.concatenate([bm, bs], axis=1)    # (1, 2*act)

    pout = _round_up(max(l1_dim, l2_dim, two_act), 128)   # lane dim (last)
    pin = max(_round_up(state_dim, 8), pout)               # sublane dim (rows)

    def pad_w(m):
        return jnp.pad(m, ((0, pin - m.shape[0]), (0, pout - m.shape[1])))

    def pad_b(v):
        return jnp.pad(v, ((0, 0), (0, pout - v.shape[1])))

    w_packed = jnp.stack([pad_w(w1), pad_w(w2), pad_w(wh)], axis=0)        # (3, P, Pout)
    b_packed = jnp.concatenate([pad_b(b1), pad_b(b2), pad_b(bh)], axis=0)  # (3, Pout)

    return dict(w=w_packed, b=b_packed,
                state_dim=int(state_dim), l1_dim=int(l1_dim),
                l2_dim=int(l2_dim), action_dim=int(action_dim),
                lat_dim=int(pout), pin_dim=int(pin))


def _vmem_bytes_estimate(tb, state_dim, pin, pout, action_dim):
    f32 = 4
    lane = 128
    wb = 3 * pin * pout * f32                                 # resident weights
    bb = 8 * pout * f32                                       # biases (sublane pad)
    xb = 2 * tb * _round_up(state_dim, lane) * f32            # double-buffered state
    ob = 2 * 2 * tb * _round_up(action_dim, lane) * f32       # 2 outputs, 2 buffers
    act = 3 * tb * pout * f32                                 # h1 / h2 / heads values
    return wb + bb + xb + ob + act


def policy_network_forward(state, packed):
    """state: (B, state_dim) f32. Returns (mean, log_std), each (B, action_dim)."""
    B, state_dim = state.shape
    assert state_dim == packed["state_dim"]
    action_dim = packed["action_dim"]
    lat_dim = packed["lat_dim"]
    pin_dim = packed["pin_dim"]
    w, b = packed["w"], packed["b"]

    # Batch tile: large tiles (fewer ~0.35us grid steps), but split so big batches
    # give >= 2 grid steps for v7x's two TensorCores.  Shrink if VMEM estimate is big.
    if B <= 8:
        tb = B
    else:
        tb = min(_MAX_BATCH_TILE, max(8, _round_up(pl.cdiv(B, 2), 8)))
        while tb > 8 and _vmem_bytes_estimate(tb, state_dim, pin_dim,
                                              lat_dim, action_dim) > _VMEM_BUDGET:
            tb = max(8, _round_up(tb // 2, 8))
    grid = (pl.cdiv(B, tb),)

    vmem_limit = int(min(
        _VMEM_BUDGET,
        max(32 * 1024 * 1024,
            2 * _vmem_bytes_estimate(tb, state_dim, pin_dim, lat_dim, action_dim))))

    kernel = _make_policy_kernel(state_dim, lat_dim, action_dim)

    mean, log_std = pl.pallas_call(
        kernel,
        out_shape=(jax.ShapeDtypeStruct((B, action_dim), jnp.float32),
                   jax.ShapeDtypeStruct((B, action_dim), jnp.float32)),
        grid=grid,
        in_specs=[
            pl.BlockSpec((tb, state_dim), lambda i: (i, 0)),   # batch-tiled state
            pl.BlockSpec(w.shape, lambda i: (0, 0, 0)),        # VMEM-resident weights
            pl.BlockSpec(b.shape, lambda i: (0, 0)),           # VMEM-resident biases
        ],
        out_specs=(pl.BlockSpec((tb, action_dim), lambda i: (i, 0)),
                   pl.BlockSpec((tb, action_dim), lambda i: (i, 0))),
        compiler_params=pltpu.CompilerParams(
            dimension_semantics=("parallel",),                 # v7x: shard over 2 TCs
            vmem_limit_bytes=vmem_limit),
    )(state, w, b)

    return mean, log_std


def init_params(key, state_dim, l1_dim, l2_dim, action_dim, init_w=0.003):
    """Deterministic init mirroring the PyTorch module's __init__.
    Weights stored as (in, out) == PyTorch weight.T."""
    ks = jax.random.split(key, 8)

    def default_linear(kw, kb, fan_in, fan_out):
        # PyTorch nn.Linear default: U(-1/sqrt(fan_in), 1/sqrt(fan_in))
        bound = 1.0 / jnp.sqrt(jnp.float32(fan_in))
        wgt = jax.random.uniform(kw, (fan_in, fan_out), jnp.float32, -bound, bound)
        bias = jax.random.uniform(kb, (1, fan_out), jnp.float32, -bound, bound)
        return wgt, bias

    w1, b1 = default_linear(ks[0], ks[1], state_dim, l1_dim)
    w2, b2 = default_linear(ks[2], ks[3], l1_dim, l2_dim)
    # mean / log_std heads: U(-init_w, init_w) as in the module.
    wm = jax.random.uniform(ks[4], (l2_dim, action_dim), jnp.float32, -init_w, init_w)
    bm = jax.random.uniform(ks[5], (1, action_dim), jnp.float32, -init_w, init_w)
    ws = jax.random.uniform(ks[6], (l2_dim, action_dim), jnp.float32, -init_w, init_w)
    bs = jax.random.uniform(ks[7], (1, action_dim), jnp.float32, -init_w, init_w)

    return dict(w1=w1, b1=b1, w2=w2, b2=b2, wm=wm, bm=bm, ws=ws, bs=bs)


def _reference_forward(state, p):
    h1 = jnp.maximum(state @ p["w1"] + p["b1"], 0.0)
    h2 = jnp.maximum(h1 @ p["w2"] + p["b2"], 0.0)
    mean = h2 @ p["wm"] + p["bm"]
    log_std = jnp.clip(h2 @ p["ws"] + p["bs"], LOG_STD_MIN, LOG_STD_MAX)
    return mean, log_std


if __name__ == "__main__":
    # Small shapes consistent with the module's forward.
    batch, state_dim, l1_dim, l2_dim, action_dim = 8, 16, 32, 32, 4

    key = jax.random.PRNGKey(0)
    k_state, k_params = jax.random.split(key)
    state = jax.random.normal(k_state, (batch, state_dim), jnp.float32)
    params = init_params(k_params, state_dim, l1_dim, l2_dim, action_dim)
    packed = pack_params(params)  # pack/pad once; reuse across calls

    mean, log_std = policy_network_forward(state, packed)
    jax.block_until_ready((mean, log_std))

    # Correctness check against pure-JAX reference.
    ref_mean, ref_log_std = _reference_forward(state, params)
    assert mean.shape == (batch, action_dim) and log_std.shape == (batch, action_dim)
    assert jnp.allclose(mean, ref_mean, atol=1e-5, rtol=1e-5)
    assert jnp.allclose(log_std, ref_log_std, atol=1e-5, rtol=1e-5)

    # TODO(synk): evaluate()/get_logprob() (Normal/MultivariateNormal sampling,
    # tanh squashing, log-prob) are outside forward(); fuse them here if this runs
    # at small RL-inference batch sizes, since launch overhead dominates.

    print("KERNEL_OK")
</pallas_src>

<mosaic_0001>
module attributes {stable_mosaic.version = 11 : i64} {
  func.func @kernel(%arg0: i32, %arg1: memref<8x16xf32, #tpu.memory_space<vmem>>, %arg2: memref<3x128x128xf32, #tpu.memory_space<vmem>>, %arg3: memref<3x128xf32, #tpu.memory_space<vmem>>, %arg4: memref<8x4xf32, #tpu.memory_space<vmem>>, %arg5: memref<8x4xf32, #tpu.memory_space<vmem>>) attributes {dimension_semantics = [#tpu.dimension_semantics<parallel>], iteration_bounds = array<i64: 1>, scalar_prefetch = 0 : i64, scratch_operands = 0 : i64, tpu.core_type = #tpu.core_type<tc>, window_params = [{transform_indices = @transform_0, window_bounds = array<i64: 8, 16>}, {pipeline_mode = #tpu.pipeline_mode<synchronous>, transform_indices = @transform_1, window_bounds = array<i64: 3, 128, 128>}, {pipeline_mode = #tpu.pipeline_mode<synchronous>, transform_indices = @transform_2, window_bounds = array<i64: 3, 128>}, {transform_indices = @transform_3, window_bounds = array<i64: 8, 4>}, {transform_indices = @transform_4, window_bounds = array<i64: 8, 4>}]} {
    %c0 = arith.constant 0 : index
    %c0_0 = arith.constant 0 : index
    %0 = vector.load %arg1[%c0, %c0_0] : memref<8x16xf32, #tpu.memory_space<vmem>>, vector<8x16xf32>
    %c0_1 = arith.constant 0 : index
    %c0_2 = arith.constant 0 : index
    %c0_3 = arith.constant 0 : index
    %1 = vector.load %arg2[%c0_1, %c0_2, %c0_3] : memref<3x128x128xf32, #tpu.memory_space<vmem>>, vector<1x16x128xf32>
    %2 = vector.shape_cast %1 : vector<1x16x128xf32> to vector<16x128xf32>
    %cst = arith.constant dense<0.000000e+00> : vector<8x128xf32>
    %3 = tpu.matmul %0, %2, %cst {dimension_numbers = #tpu.dot_dimension_numbers<[1], [0], [0], [1], [0, 0, 1, 1], [], []>} : vector<8x16xf32>, vector<16x128xf32>, vector<8x128xf32> -> vector<8x128xf32>
    %c0_4 = arith.constant 0 : index
    %c0_5 = arith.constant 0 : index
    %4 = vector.load %arg3[%c0_4, %c0_5] : memref<3x128xf32, #tpu.memory_space<vmem>>, vector<1x128xf32>
    %5 = vector.broadcast %4 : vector<1x128xf32> to vector<8x128xf32>
    %6 = arith.addf %3, %5 : vector<8x128xf32>
    %cst_6 = arith.constant 0.000000e+00 : f32
    %7 = vector.broadcast %cst_6 : f32 to vector<8x128xf32>
    %8 = arith.maximumf %6, %7 : vector<8x128xf32>
    %c1 = arith.constant 1 : index
    %c0_7 = arith.constant 0 : index
    %c0_8 = arith.constant 0 : index
    %9 = vector.load %arg2[%c1, %c0_7, %c0_8] : memref<3x128x128xf32, #tpu.memory_space<vmem>>, vector<1x128x128xf32>
    %10 = vector.shape_cast %9 : vector<1x128x128xf32> to vector<128x128xf32>
    %cst_9 = arith.constant dense<0.000000e+00> : vector<8x128xf32>
    %11 = tpu.matmul %8, %10, %cst_9 {dimension_numbers = #tpu.dot_dimension_numbers<[1], [0], [0], [1], [0, 0, 1, 1], [], []>} : vector<8x128xf32>, vector<128x128xf32>, vector<8x128xf32> -> vector<8x128xf32>
    %c1_10 = arith.constant 1 : index
    %c0_11 = arith.constant 0 : index
    %12 = vector.load %arg3[%c1_10, %c0_11] : memref<3x128xf32, #tpu.memory_space<vmem>>, vector<1x128xf32>
    %13 = vector.broadcast %12 : vector<1x128xf32> to vector<8x128xf32>
    %14 = arith.addf %11, %13 : vector<8x128xf32>
    %cst_12 = arith.constant 0.000000e+00 : f32
    %15 = vector.broadcast %cst_12 : f32 to vector<8x128xf32>
    %16 = arith.maximumf %14, %15 : vector<8x128xf32>
    %c2 = arith.constant 2 : index
    %c0_13 = arith.constant 0 : index
    %c0_14 = arith.constant 0 : index
    %17 = vector.load %arg2[%c2, %c0_13, %c0_14] : memref<3x128x128xf32, #tpu.memory_space<vmem>>, vector<1x128x128xf32>
    %18 = vector.shape_cast %17 : vector<1x128x128xf32> to vector<128x128xf32>
    %cst_15 = arith.constant dense<0.000000e+00> : vector<8x128xf32>
    %19 = tpu.matmul %16, %18, %cst_15 {dimension_numbers = #tpu.dot_dimension_numbers<[1], [0], [0], [1], [0, 0, 1, 1], [], []>} : vector<8x128xf32>, vector<128x128xf32>, vector<8x128xf32> -> vector<8x128xf32>
    %c2_16 = arith.constant 2 : index
    %c0_17 = arith.constant 0 : index
    %20 = vector.load %arg3[%c2_16, %c0_17] : memref<3x128xf32, #tpu.memory_space<vmem>>, vector<1x128xf32>
    %21 = vector.broadcast %20 : vector<1x128xf32> to vector<8x128xf32>
    %22 = arith.addf %19, %21 : vector<8x128xf32>
    %23 = vector.extract_strided_slice %22 {offsets = [0, 0], sizes = [8, 4], strides = [1, 1]} : vector<8x128xf32> to vector<8x4xf32>
    %c0_18 = arith.constant 0 : index
    %c0_19 = arith.constant 0 : index
    %24 = vector.load %arg4[%c0_18, %c0_19] : memref<8x4xf32, #tpu.memory_space<vmem>>, vector<8x4xf32>
    tpu.vector_store %arg4[%c0_18, %c0_19], %23 {strides = array<i32>} : memref<8x4xf32, #tpu.memory_space<vmem>>, vector<8x4xf32>,
    %25 = vector.extract_strided_slice %22 {offsets = [0, 4], sizes = [8, 4], strides = [1, 1]} : vector<8x128xf32> to vector<8x4xf32>
    %cst_20 = arith.constant -2.000000e+01 : f32
    %cst_21 = arith.constant 2.000000e+00 : f32
    %26 = vector.broadcast %cst_20 : f32 to vector<8x4xf32>
    %27 = arith.maximumf %26, %25 : vector<8x4xf32>
    %28 = vector.broadcast %cst_21 : f32 to vector<8x4xf32>
    %29 = arith.minimumf %28, %27 : vector<8x4xf32>
    %c0_22 = arith.constant 0 : index
    %c0_23 = arith.constant 0 : index
    %30 = vector.load %arg5[%c0_22, %c0_23] : memref<8x4xf32, #tpu.memory_space<vmem>>, vector<8x4xf32>
    tpu.vector_store %arg5[%c0_22, %c0_23], %29 {strides = array<i32>} : memref<8x4xf32, #tpu.memory_space<vmem>>, vector<8x4xf32>,
    return
  }
  func.func @transform_0(%arg0: i32) -> (i32, i32) {
    %c0_i32 = arith.constant 0 : i32
    %c0_i32_0 = arith.constant 0 : i32
    return %arg0, %c0_i32 : i32, i32
  }
  func.func @transform_1(%arg0: i32) -> (i32, i32, i32) {
    %c0_i32 = arith.constant 0 : i32
    %c0_i32_0 = arith.constant 0 : i32
    %c0_i32_1 = arith.constant 0 : i32
    %c0_i32_2 = arith.constant 0 : i32
    return %c0_i32, %c0_i32_0, %c0_i32_1 : i32, i32, i32
  }
  func.func @transform_2(%arg0: i32) -> (i32, i32) {
    %c0_i32 = arith.constant 0 : i32
    %c0_i32_0 = arith.constant 0 : i32
    %c0_i32_1 = arith.constant 0 : i32
    return %c0_i32, %c0_i32_0 : i32, i32
  }
  func.func @transform_3(%arg0: i32) -> (i32, i32) {
    %c0_i32 = arith.constant 0 : i32
    %c0_i32_0 = arith.constant 0 : i32
    return %arg0, %c0_i32 : i32, i32
  }
  func.func @transform_4(%arg0: i32) -> (i32, i32) {
    %c0_i32 = arith.constant 0 : i32
    %c0_i32_0 = arith.constant 0 : i32
    return %arg0, %c0_i32 : i32, i32
  }
}

</mosaic_0001>

<bundles_post_ra>
// kernel: tpu_custom_call.1
= control target key start
LH: loop header
LB: loop body
LE: loop exit
PB: predicated region body
PF: predicated region fallthrough
CT: control target
= control target key end

     0   :  { %10 = vsyncpa [#allocation3], 0  ;;  %s653_s0 = inlined_call_operand.hbm [shape: f32[8,16], index: 0, kind: input, shape index: {}]   ;;  %s654_s1 = inlined_call_operand.hbm [shape: f32[3,128,128], index: 1, kind: input, shape index: {}]   ;;  %s655_s2 = inlined_call_operand.vmem [shape: f32[3,128], index: 2, kind: input, shape index: {}]   ;;  %s656_s3 = inlined_call_operand.vmem [shape: f32[8,4], index: 3, kind: output, shape index: {0}]   ;;  %s657_s4 = inlined_call_operand.vmem [shape: f32[8,4], index: 4, kind: output, shape index: {1}]  }
   0x1   :  { %11 = vsyncpa [#allocation5], 0  ;;  %s554_s15 = smov [#allocation2]   ;;  %s555_s17 = smov [#allocation4]  }
   0x2   :  { %s18_s16 = sshll.u32 %s554_s15, 4  ;;  %s27_s18 = sshll.u32 %s555_s17, 4  ;;  %s19_s16 = int_to_ptr.vmem [resolvable:$true] %s18_s16  ;;  %s587_s18 = int_to_ptr.vmem [resolvable:$true] %s27_s18 }
   0x3   :  { %s506_s21 = scalar_lea.hbm %s653_s0, 128 }
   0x4   :  { %p507_p0 = scmp.ne.s32.totalorder %s653_s0, %s506_s21  ;;  %p510_p1 = scmp.lt.u32.totalorder %s506_s21, %s653_s0 }
   0x6   :  { %p512_p2 = pnand %p510_p1, %p507_p0 }
   0x8   :  { %515 = shalt.err (!%p512_p2)
}
   0x9   :  { %s516_s26 = scalar_lea.vmem %s19_s16, 128  ;;  %p521_p4 = scmp.lt.s32.totalorder %s19_s16, %s19_s16 }
   0xa   :  { %p517_p3 = scmp.ne.s32.totalorder %s19_s16, %s516_s26  ;;  %p522_p5 = scmp.lt.s32.totalorder %s516_s26, %s516_s26 }
   0xc   :  { %p523_p6 = por %p522_p5, %p521_p4 }
   0xe   :  { %p524_p7 = pnand %p523_p6, %p517_p3 }
  0x10   :  { %527 = shalt.err (!%p524_p7)
}
  0x11   :  { %21 = dma.hbm_to_vmem [thread:$0]  %s653_s0, 128, %s19_s16, [#allocation3]  }
  0x12   :  { %s528_s5 = scalar_lea.hbm %s654_s1, 6144 }
  0x13   :  { %p529_p8 = scmp.ne.s32.totalorder %s654_s1, %s528_s5  ;;  %p532_p9 = scmp.lt.u32.totalorder %s528_s5, %s654_s1 }
  0x15   :  { %p534_p10 = pnand %p532_p9, %p529_p8 }
  0x17   :  { %537 = shalt.err (!%p534_p10)
}
  0x18   :  { %s538_s10 = scalar_lea.vmem %s587_s18, 6144  ;;  %p543_p12 = scmp.lt.s32.totalorder %s587_s18, %s587_s18 }
  0x19   :  { %p539_p11 = scmp.ne.s32.totalorder %s587_s18, %s538_s10  ;;  %p544_p13 = scmp.lt.s32.totalorder %s538_s10, %s538_s10 }
  0x1b   :  { %p545_p0 = por %p544_p13, %p543_p12 }
  0x1d   :  { %p546_p1 = pnand %p545_p0, %p539_p11 }
  0x1f   :  { %549 = shalt.err (!%p546_p1)
}
  0x20   :  { %s556_s0 = smov 128   ;;  %s557_s11 = smov 8  }
  0x21   :  { %33 = dma.hbm_to_vmem [thread:$0]  %s654_s1, 6144, %s587_s18, [#allocation5], %s556_s0, %s556_s0, %s557_s11  }
  0x22   :  { %550 = dma.done.wait [#allocation3], 128  }
  0x23   :  { %551 = vsyncadd [#allocation3], 4294967168 }
  0x24   :  { %552 = dma.done.wait [#allocation5], 6144  }
  0x25   :  { %553 = vsyncadd [#allocation5], 4294961152  ;;  %v558_v0 = vmov 0.0|0.0   ;;  %vm559_vm0 = vmmov 0   ;;  %v560_v1 = vmov 0.0   ;;  %v43_v2 = vld [vmem:[#allocation4] sm:$0xff] }
  0x26   :  { %447 = vmatprep.subr.bf16.mxu0 %v558_v0  ;;  %374 = vmatprep.mubr.msk.f32.mxu0 %vm559_vm0, %v560_v1  ;;  %v44_v3 = vld [vmem:[#allocation4 + $0x8] sm:$0xff]  ;;  %v126_v5 = vld [vmem:[#allocation4 + $0x80] sm:$0xff]  ;;  %v128_v7 = vld [vmem:[#allocation4 + $0x90] sm:$0xff]  ;;  %vm50_vm1 = vcmask 130048   ;;  %vm310_vm2 = vcmask 31744   ;;  %s561_s21 = smov 124  }
  0x27   :  { %450 = vmatprep.subr.bf16.mxu1 %v558_v0  ;;  %409 = vmatprep.mubr.msk.f32.mxu1 %vm559_vm0, %v560_v1  ;;  %v448_v4 = vpack.c.bf16 %v44_v3, %v43_v2  ;;  %v127_v6 = vld [vmem:[#allocation4 + $0x88] sm:$0xff]  ;;  %v129_v9 = vld [vmem:[#allocation4 + $0x98] sm:$0xff]  ;;  %v130_v12 = vld [vmem:[#allocation4 + $0xa0] sm:$0xff] }
  0x28   :  { %v451_v8 = vpack.c.bf16 %v127_v6, %v126_v5  ;;  %v42_v10 = vld [vmem:[#allocation2] sm:$0xff]  ;;  %v454_v11 = vpack.c.bf16 %v129_v9, %v128_v7  ;;  %v131_v13 = vld [vmem:[#allocation4 + $0xa8] sm:$0xff]  ;;  %v132_v15 = vld [vmem:[#allocation4 + $0xb0] sm:$0xff] }
  0x29   :  { %449 = vmatpush3.bf16.msra.mxu0 %v448_v4  ;;  %v457_v14 = vpack.c.bf16 %v131_v13, %v130_v12  ;;  %v133_v16 = vld [vmem:[#allocation4 + $0xb8] sm:$0xff]  ;;  %v134_v18 = vld [vmem:[#allocation4 + $0xc0] sm:$0xff]  ;;  %v135_v19 = vld [vmem:[#allocation4 + $0xc8] sm:$0xff] }
  0x2a   :  { %452 = vmatpush3.bf16.msra.mxu1 %v451_v8  ;;  %474 = vmatprep.subr.bf16.mxu0 %v558_v0  ;;  %v460_v17 = vpack.c.bf16 %v133_v16, %v132_v15  ;;  %v463_v20 = vpack.c.bf16 %v135_v19, %v134_v18  ;;  %v136_v21 = vld [vmem:[#allocation4 + $0xd0] sm:$0xff]  ;;  %v137_v22 = vld [vmem:[#allocation4 + $0xd8] sm:$0xff]  ;;  %v138_v24 = vld [vmem:[#allocation4 + $0xe0] sm:$0xff] }
  0x2b   :  { %453 = vmatprep.subr.bf16.mxu1 %v558_v0  ;;  %v466_v23 = vpack.c.bf16 %v137_v22, %v136_v21  ;;  %v139_v25 = vld [vmem:[#allocation4 + $0xe8] sm:$0xff]  ;;  %v140_v27 = vld [vmem:[#allocation4 + $0xf0] sm:$0xff]  ;;  %v141_v28 = vld [vmem:[#allocation4 + $0xf8] sm:$0xff] }
  0x2c   :  { %375 = vmatmul.mubr.msk.f32.vlgmr.msra.gmra.mrb[0].mxu0 %vm50_vm1, %v42_v10  ;;  %v469_v26 = vpack.c.bf16 %v139_v25, %v138_v24  ;;  %v472_v29 = vpack.c.bf16 %v141_v28, %v140_v27  ;;  %v219_v30 = vld [vmem:[#allocation4 + $0x100] sm:$0xff]  ;;  %v220_v31 = vld [vmem:[#allocation4 + $0x108] sm:$0xff]  ;;  %v221_v32 = vld [vmem:[#allocation4 + $0x110] sm:$0xff] }
  0x2d   :  { %444 = vmatprep.mubr.msk.f32.mxu0 %vm559_vm0, %v560_v1  ;;  %v475_v33 = vpack.c.bf16 %v220_v31, %v219_v30  ;;  %v222_v34 = vld [vmem:[#allocation4 + $0x118] sm:$0xff]  ;;  %v223_v36 = vld [vmem:[#allocation4 + $0x120] sm:$0xff]  ;;  %v224_v37 = vld [vmem:[#allocation4 + $0x128] sm:$0xff] }
  0x2e   :  { %455 = vmatpush3.bf16.msra.mxu1 %v454_v11  ;;  %v478_v35 = vpack.c.bf16 %v222_v34, %v221_v32  ;;  %v481_v38 = vpack.c.bf16 %v224_v37, %v223_v36  ;;  %v225_v39 = vld [vmem:[#allocation4 + $0x130] sm:$0xff]  ;;  %v226_v40 = vld [vmem:[#allocation4 + $0x138] sm:$0xff]  ;;  %v227_v42 = vld [vmem:[#allocation4 + $0x140] sm:$0xff] }
  0x2f   :  { %456 = vmatprep.subr.bf16.mxu1 %v558_v0  ;;  %476 = vmatpush3.bf16.msra.mxu0 %v475_v33  ;;  %v484_v41 = vpack.c.bf16 %v226_v40, %v225_v39  ;;  %v228_v43 = vld [vmem:[#allocation4 + $0x148] sm:$0xff]  ;;  %v229_v45 = vld [vmem:[#allocation4 + $0x150] sm:$0xff]  ;;  %v230_v46 = vld [vmem:[#allocation4 + $0x158] sm:$0xff] }
  0x30   :  { %477 = vmatprep.subr.bf16.mxu0 %v558_v0  ;;  %v487_v44 = vpack.c.bf16 %v228_v43, %v227_v42  ;;  %v490_v47 = vpack.c.bf16 %v230_v46, %v229_v45  ;;  %v231_v48 = vld [vmem:[#allocation4 + $0x160] sm:$0xff]  ;;  %v232_v49 = vld [vmem:[#allocation4 + $0x168] sm:$0xff]  ;;  %v329_v51 = vld [vmem:[%s655_s2] ss:$0 sm:$0xff] }
  0x31   :  { %v493_v50 = vpack.c.bf16 %v232_v49, %v231_v48  ;;  %v233_v56 = vld [vmem:[#allocation4 + $0x170] sm:$0xff]  ;;  %v234_v57 = vld [vmem:[#allocation4 + $0x178] sm:$0xff] }
  0x32   :  { %458 = vmatpush3.bf16.msra.mxu1 %v457_v14  ;;  %v496_v58 = vpack.c.bf16 %v234_v57, %v233_v56  ;;  %v331_v59 = vld [vmem:[%s655_s2 + $0x1] ss:$0 sm:$0xff] }
  0x33   :  { %459 = vmatprep.subr.bf16.mxu1 %v558_v0  ;;  %479 = vmatpush3.bf16.msra.mxu0 %v478_v35 }
  0x34   :  { %480 = vmatprep.subr.bf16.mxu0 %v558_v0 }
  0x36   :  { %461 = vmatpush3.bf16.msra.mxu1 %v460_v17 }
  0x37   :  { %462 = vmatprep.subr.bf16.mxu1 %v558_v0  ;;  %482 = vmatpush3.bf16.msra.mxu0 %v481_v38 }
  0x38   :  { %483 = vmatprep.subr.bf16.mxu0 %v558_v0 }
  0x3a   :  { %464 = vmatpush3.bf16.msra.mxu1 %v463_v20 }
  0x3b   :  { %465 = vmatprep.subr.bf16.mxu1 %v558_v0  ;;  %485 = vmatpush3.bf16.msra.mxu0 %v484_v41 }
  0x3c   :  { %486 = vmatprep.subr.bf16.mxu0 %v558_v0 }
  0x3e   :  { %467 = vmatpush3.bf16.msra.mxu1 %v466_v23 }
  0x3f   :  { %468 = vmatprep.subr.bf16.mxu1 %v558_v0  ;;  %488 = vmatpush3.bf16.msra.mxu0 %v487_v44 }
  0x40   :  { %489 = vmatprep.subr.bf16.mxu0 %v558_v0 }
  0x42   :  { %470 = vmatpush3.bf16.msra.mxu1 %v469_v26 }
  0x43   :  { %471 = vmatprep.subr.bf16.mxu1 %v558_v0  ;;  %491 = vmatpush3.bf16.msra.mxu0 %v490_v47 }
  0x44   :  { %492 = vmatprep.subr.bf16.mxu0 %v558_v0 }
  0x46   :  { %473 = vmatpush3.bf16.msra.mxu1 %v472_v29 }
  0x47   :  { %494 = vmatpush3.bf16.msra.mxu0 %v493_v50 }
  0x48   :  { %495 = vmatprep.subr.bf16.mxu0 %v558_v0  ;;  %v332_v0 = vld [vmem:[%s655_s2 + $0x2] ss:$0 sm:$0xff] }
  0x4b   :  { %497 = vmatpush3.bf16.msra.mxu0 %v496_v58 }
  0xff   :  { %v120_v52 = vpop.f32.mrb[0].mxu0 }
 0x100   :  { %v121_v53 = vadd.f32 %v329_v51, %v120_v52  ;;  %v376_v54 = vpop.f32.mrb[1].mxu0 }
 0x102   :  { %v124_v55 = vmax.f32 %v121_v53, 0.0 }
 0x104   :  { %410 = vmatmul.mubr.f32.vlgmr.msra.gmra.mrb[0].mxu1 %v124_v55 }
 0x1d7   :  { %v213_v60 = vpop.f32.mrb[0].mxu1 }
 0x1d8   :  { %v214_v61 = vadd.f32 %v331_v59, %v213_v60  ;;  %v411_v62 = vpop.f32.mrb[1].mxu1 }
 0x1da   :  { %v217_v63 = vmax.f32 %v214_v61, 0.0 }
 0x1dc   :  { %445 = vmatmul.mubr.f32.vlgmr.msra.gmra.mrb[2].mxu0 %v217_v63 }
 0x2af   :  { %v306_v1 = vpop.f32.mrb[2].mxu0 }
 0x2b0   :  { %v307_v2 = vadd.f32 %v332_v0, %v306_v1  ;;  %v446_v3 = vpop.f32.mrb[3].mxu0 }
 0x2b2   :  { %v312_v4 = vmax.f32 %v307_v2, -20.0  ;;  %311 = vst.msk [vmem:[%s656_s3] sm:$0xff] %vm310_vm2, %v307_v2 }
 0x2b4   :  { %v313_v5 = vmin.f32 %v312_v4, 2.0 }
 0x2b6   :  { %315 = vrot.lane.b32.xlu0 %v313_v5, %s561_s21 }
 0x328   :  { %v316_v6 = vpop.permute.xlu0 %315 }
 0x329   :  { %318 = vst.msk [vmem:[%s657_s4] sm:$0xff] %vm310_vm2, %v316_v6 }
 0x32a   :  { %327 = vsyncpa [#allocation3], 1 }
 0x32b   :  { %328 = vsyncpa [#allocation5], 1 }

</bundles_post_ra>
